<compile_context>
chip_gen: v5e
topology: v5e:2x2
jax: 0.10.0
libtpu: 0.0.40
codegen_flags: <defaults>
</compile_context>

<pallas_src>
import numpy as np
import jax
import jax.numpy as jnp
from jax.experimental import pallas as pl
from jax.experimental.pallas import tpu as pltpu  # noqa: F401

# ---------------- module config (defaults of KernelPredictor) ----------------
STYLE_DIM  = 128
NUM_LAYERS = 4      # enc_layer
KER_SIZE   = 9
IN_CH      = 8
OUT_CH     = 8

D_W_CH = NUM_LAYERS * KER_SIZE * IN_CH      # 288
D_G_CH = NUM_LAYERS * IN_CH                 # 32
D_B_CH = NUM_LAYERS * IN_CH                 # 32
P_W_CH = NUM_LAYERS * IN_CH * OUT_CH        # 256
P_G_CH = NUM_LAYERS * OUT_CH                # 32
P_B_CH = NUM_LAYERS * OUT_CH                # 32
TOTAL  = D_W_CH + D_G_CH + D_B_CH + P_W_CH + P_G_CH + P_B_CH   # 672

LANE    = 128
SUBLANE = 8


def _round_up(n, m):
    return ((n + m - 1) // m) * m


# 128-aligned column layout: each logical segment padded to a multiple of 128 lanes.
SEG_WIDTHS     = (D_W_CH, D_G_CH, D_B_CH, P_W_CH, P_G_CH, P_B_CH)
SEG_LOG_STARTS = tuple(int(s) for s in np.cumsum((0,) + SEG_WIDTHS[:-1]))   # logical offsets
SEG_PAD_WIDTHS = tuple(_round_up(w, LANE) for w in SEG_WIDTHS)              # (384,128,128,256,128,128)
SEG_PAD_STARTS = tuple(int(s) for s in np.cumsum((0,) + SEG_PAD_WIDTHS[:-1]))
T_PAD          = int(sum(SEG_PAD_WIDTHS))                                    # 1152 = 9 * 128


# ---------------- Pallas kernel ----------------
def kernel_predictor_kernel(x_ref, w_ref, b_ref, o_ref):
    """Fused projection: (B_pad, S)bf16 @ (S, T_pad)bf16 -> f32 acc, + f32 bias.

    Single invocation (no grid); all refs are whole arrays resident in VMEM.
    Output is (8k, 9*128) f32 -> fully lane/sublane-dense, unmasked vst.
    """
    o_ref[...] = (
        jnp.dot(x_ref[...], w_ref[...], preferred_element_type=jnp.float32)
        + b_ref[...]
    )


# ---------------- wrapper ----------------
def kernel_predictor_forward(x, w_pad_bf16, b_pad_f32):
    """Forward pass of KernelPredictor.

    x          : (B, STYLE_DIM) style vector (f32).
    w_pad_bf16 : (STYLE_DIM, T_PAD) bf16 — nn.Linear weight, pre-transposed and
                 column-scattered into the 128-aligned segment layout.
    b_pad_f32  : (1, T_PAD) f32 — bias in the same padded layout.
    Returns (d_w, d_g, d_b, p_w, p_g, p_b) with the PyTorch module's shapes.
    """
    B = x.shape[0]
    B_pad = max(SUBLANE, _round_up(B, SUBLANE))

    # Pad batch to a full sublane tile; feed the MXU bf16 activations.
    x_p = jnp.zeros((B_pad, STYLE_DIM), jnp.bfloat16).at[:B, :].set(
        x.astype(jnp.bfloat16))

    y_pad = pl.pallas_call(
        kernel_predictor_kernel,
        out_shape=jax.ShapeDtypeStruct((B_pad, T_PAD), jnp.float32),
        # No grid, no BlockSpecs: whole arrays are single VMEM blocks, single-buffered.
    )(x_p, w_pad_bf16, b_pad_f32)

    # Strip batch padding; every segment slice below starts on a 128-lane boundary.
    y = y_pad[:B]
    d_w, d_g, d_b, p_w, p_g, p_b = (
        y[:, s:s + w] for s, w in zip(SEG_PAD_STARTS, SEG_WIDTHS))

    # torch.split + .view equivalents — layout plumbing only.
    d_w = d_w.reshape(B, NUM_LAYERS, IN_CH, 1, KER_SIZE)
    d_g = d_g.reshape(B, NUM_LAYERS, IN_CH)
    d_b = d_b.reshape(B, NUM_LAYERS, IN_CH)
    p_w = p_w.reshape(B, NUM_LAYERS, OUT_CH, IN_CH, 1)
    p_g = p_g.reshape(B, NUM_LAYERS, OUT_CH)
    p_b = p_b.reshape(B, NUM_LAYERS, OUT_CH)
    return d_w, d_g, d_b, p_w, p_g, p_b


# ---------------- deterministic parameter initialization ----------------
def init_params(key):
    """nn.Linear default init: U(-1/sqrt(in), 1/sqrt(in)) for weight and bias.
    Logical (un-padded) layout, weight pre-transposed to (STYLE_DIM, TOTAL)."""
    kw, kb = jax.random.split(key)
    bound = 1.0 / np.sqrt(STYLE_DIM)
    w_t = jax.random.uniform(kw, (STYLE_DIM, TOTAL), jnp.float32, -bound, bound)
    b = jax.random.uniform(kb, (1, TOTAL), jnp.float32, -bound, bound)
    return w_t, b


def pack_params(w_t, b):
    """Scatter logical columns into the 128-aligned padded layout (done once,
    offline); weight is stored bf16, bias stays f32."""
    w_pad = jnp.zeros((STYLE_DIM, T_PAD), jnp.float32)
    b_pad = jnp.zeros((1, T_PAD), jnp.float32)
    for ls, ps, w in zip(SEG_LOG_STARTS, SEG_PAD_STARTS, SEG_WIDTHS):
        w_pad = w_pad.at[:, ps:ps + w].set(w_t[:, ls:ls + w])
        b_pad = b_pad.at[:, ps:ps + w].set(b[:, ls:ls + w])
    return w_pad.astype(jnp.bfloat16), b_pad


# ---------------- driver ----------------
if __name__ == "__main__":
    B = 2

    key = jax.random.PRNGKey(0)
    k_param, k_x = jax.random.split(key)

    w_t, b = init_params(k_param)
    x = jax.random.normal(k_x, (B, STYLE_DIM), jnp.float32)
    w_pad, b_pad = pack_params(w_t, b)

    fwd = jax.jit(kernel_predictor_forward)
    outs = jax.block_until_ready(fwd(x, w_pad, b_pad))
    d_w, d_g, d_b, p_w, p_g, p_b = outs

    # shape checks against the PyTorch reference
    assert d_w.shape == (B, NUM_LAYERS, IN_CH, 1, KER_SIZE)
    assert d_g.shape == (B, NUM_LAYERS, IN_CH)
    assert d_b.shape == (B, NUM_LAYERS, IN_CH)
    assert p_w.shape == (B, NUM_LAYERS, OUT_CH, IN_CH, 1)
    assert p_g.shape == (B, NUM_LAYERS, OUT_CH)
    assert p_b.shape == (B, NUM_LAYERS, OUT_CH)

    y_got = jnp.concatenate(
        [d_w.reshape(B, -1), d_g.reshape(B, -1), d_b.reshape(B, -1),
         p_w.reshape(B, -1), p_g.reshape(B, -1), p_b.reshape(B, -1)], axis=1)

    # reference with the same bf16 input quantization + f32 accumulation
    y_ref_bf16 = jnp.dot(x.astype(jnp.bfloat16), w_t.astype(jnp.bfloat16),
                         preferred_element_type=jnp.float32) + b
    np.testing.assert_allclose(np.asarray(y_got), np.asarray(y_ref_bf16),
                               rtol=1e-2, atol=1e-2)

    # loose check against the pure-f32 reference (bf16 quantization error budget)
    y_ref_f32 = x @ w_t + b
    np.testing.assert_allclose(np.asarray(y_got), np.asarray(y_ref_f32),
                               rtol=5e-2, atol=5e-2)

    assert bool(jnp.all(jnp.isfinite(y_got)))
    print("KERNEL_OK")
</pallas_src>

<mosaic_0001>
module attributes {stable_mosaic.version = 11 : i64} {
  func.func @kernel_predictor_kernel(%arg0: memref<8x128xbf16, #tpu.memory_space<vmem>>, %arg1: memref<128x1152xbf16, #tpu.memory_space<vmem>>, %arg2: memref<1x1152xf32, #tpu.memory_space<vmem>>, %arg3: memref<8x1152xf32, #tpu.memory_space<vmem>>) attributes {dimension_semantics = [], scalar_prefetch = 0 : i64, scratch_operands = 0 : i64, tpu.core_type = #tpu.core_type<tc>} {
    %c0 = arith.constant 0 : index
    %c0_0 = arith.constant 0 : index
    %0 = vector.load %arg0[%c0, %c0_0] : memref<8x128xbf16, #tpu.memory_space<vmem>>, vector<8x128xbf16>
    %c0_1 = arith.constant 0 : index
    %c0_2 = arith.constant 0 : index
    %1 = vector.load %arg1[%c0_1, %c0_2] : memref<128x1152xbf16, #tpu.memory_space<vmem>>, vector<128x1152xbf16>
    %cst = arith.constant dense<0.000000e+00> : vector<8x1152xf32>
    %2 = tpu.matmul %0, %1, %cst {dimension_numbers = #tpu.dot_dimension_numbers<[1], [0], [0], [1], [0, 0, 1, 1], [], []>} : vector<8x128xbf16>, vector<128x1152xbf16>, vector<8x1152xf32> -> vector<8x1152xf32>
    %c0_3 = arith.constant 0 : index
    %c0_4 = arith.constant 0 : index
    %3 = vector.load %arg2[%c0_3, %c0_4] : memref<1x1152xf32, #tpu.memory_space<vmem>>, vector<1x1152xf32>
    %4 = vector.broadcast %3 : vector<1x1152xf32> to vector<8x1152xf32>
    %5 = arith.addf %2, %4 : vector<8x1152xf32>
    %c0_5 = arith.constant 0 : index
    %c0_6 = arith.constant 0 : index
    %6 = vector.load %arg3[%c0_5, %c0_6] : memref<8x1152xf32, #tpu.memory_space<vmem>>, vector<8x1152xf32>
    tpu.vector_store %arg3[%c0_5, %c0_6], %5 {strides = array<i32>} : memref<8x1152xf32, #tpu.memory_space<vmem>>, vector<8x1152xf32>,
    return
  }
}

</mosaic_0001>

<bundles_post_ra>
// kernel: kernel_predictor_forward.1
= control target key start
LH: loop header
LB: loop body
LE: loop exit
PB: predicated region body
PF: predicated region fallthrough
CT: control target
= control target key end

     0   :  { %8 = vsyncpa [#allocation3], 0  ;;  %s1135_s0 = inlined_call_operand.vmem [shape: bf16[8,128], index: 0, kind: input, shape index: {}]   ;;  %s1136_s1 = inlined_call_operand.hbm [shape: bf16[128,1152], index: 1, kind: input, shape index: {}]   ;;  %s1137_s2 = inlined_call_operand.hbm [shape: f32[1,1152], index: 2, kind: input, shape index: {}]   ;;  %s1138_s3 = inlined_call_operand.vmem [shape: f32[8,1152], index: 3, kind: output, shape index: {}]  }
   0x1   :  { %s16_s14 = sshll.u32 %s1136_s1, 4  ;;  %s17_s14 = int_to_ptr.hbm [resolvable:$true] %s16_s14 }
   0x2   :  { %9 = vsyncpa [#allocation5], 0  ;;  %s1064_s15 = smov [#allocation2]   ;;  %s30_s19 = sshll.u32 %s1137_s2, 4  ;;  %s31_s19 = int_to_ptr.hbm [resolvable:$true] %s30_s19 }
   0x3   :  { %s18_s16 = sshll.u32 %s1064_s15, 4  ;;  %s1065_s20 = smov 576   ;;  %s19_s16 = int_to_ptr.vmem [resolvable:$true] %s18_s16 }
   0x4   :  { %s1066_s21 = smov 36   ;;  %s1067_s22 = smov [#allocation4]  }
   0x5   :  { %24 = dma.hbm_to_vmem [thread:$0]  %s17_s14, 9216, %s19_s16, [#allocation3], %s1065_s20, %s1065_s20, %s1066_s21  }
   0x6   :  { %s32_s23 = sshll.u32 %s1067_s22, 4  ;;  %s33_s23 = int_to_ptr.vmem [resolvable:$true] %s32_s23 }
   0x7   :  { %35 = dma.hbm_to_vmem [thread:$0]  %s31_s19, 144, %s33_s23, [#allocation5]  }
   0x8   :  { %1060 = dma.done.wait [#allocation3], 9216  }
   0x9   :  { %1061 = vsyncadd [#allocation3], 4294958080 }
   0xa   :  { %1062 = dma.done.wait [#allocation5], 144  }
   0xb   :  { %1063 = vsyncadd [#allocation5], 4294967152  ;;  %v901_v0 = vld [vmem:[#allocation2 + $0x1f8] sm:$0xf]  ;;  %v1002_v1 = vld [vmem:[#allocation2 + $0x218] sm:$0xf0] }
   0xc   :  { %v865_v2 = vld [vmem:[#allocation2 + $0x1b0] sm:$0xf]  ;;  %v902_v3 = vor.u32 %v1002_v1, %v901_v0  ;;  %v993_v4 = vld [vmem:[#allocation2 + $0x1d0] sm:$0xf0]  ;;  %v909_v5 = vld [vmem:[#allocation2 + $0x200] sm:$0xf] }
   0xd   :  { %v866_v6 = vor.u32 %v993_v4, %v865_v2  ;;  %v1003_v7 = vld [vmem:[#allocation2 + $0x220] sm:$0xf0]  ;;  %v911_v9 = vld [vmem:[#allocation2 + $0x224] sm:$0xf0]  ;;  %v984_v11 = vld [vmem:[#allocation2 + $0x188] sm:$0xf0] }
   0xe   :  { %515 = vmatpush.bf16.msra.mxu0 %v902_v3  ;;  %v999_v8 = vld [vmem:[#allocation2 + $0x204] sm:$0xf]  ;;  %v829_v10 = vld [vmem:[#allocation2 + $0x168] sm:$0xf]  ;;  %v910_v12 = vor.u32 %v1003_v7, %v909_v5  ;;  %v873_v14 = vld [vmem:[#allocation2 + $0x1b8] sm:$0xf] }
   0xf   :  { %v914_v13 = vor.u32 %v999_v8, %v911_v9  ;;  %v994_v15 = vld [vmem:[#allocation2 + $0x1d8] sm:$0xf0]  ;;  %v875_v17 = vld [vmem:[#allocation2 + $0x1dc] sm:$0xf0]  ;;  %v830_v22 = vor.u32 %v984_v11, %v829_v10  ;;  %v837_v24 = vld [vmem:[#allocation2 + $0x170] sm:$0xf] }
  0x10   :  { %v990_v16 = vld [vmem:[#allocation2 + $0x1bc] sm:$0xf]  ;;  %v793_v18 = vld [vmem:[#allocation2 + $0x120] sm:$0xf]  ;;  %541 = vmatpush.bf16.msra.mxu2 %v910_v12  ;;  %v874_v19 = vor.u32 %v994_v15, %v873_v14  ;;  %v985_v25 = vld [vmem:[#allocation2 + $0x190] sm:$0xf0] }
  0x11   :  { %554 = vmatpush.bf16.msra.mxu3 %v914_v13  ;;  %v878_v20 = vor.u32 %v990_v16, %v875_v17  ;;  %v998_v21 = vld [vmem:[#allocation2 + $0x1fc] sm:$0xf]  ;;  %v903_v23 = vld [vmem:[#allocation2 + $0x21c] sm:$0xf0]  ;;  %v975_v26 = vld [vmem:[#allocation2 + $0x140] sm:$0xf0]  ;;  %v838_v33 = vor.u32 %v985_v25, %v837_v24 }
  0x12   :  { %516 = vmatpush.bf16.msra.mxu0 %v866_v6  ;;  %v906_v27 = vor.u32 %v998_v21, %v903_v23  ;;  %v981_v28 = vld [vmem:[#allocation2 + $0x174] sm:$0xf]  ;;  %v839_v29 = vld [vmem:[#allocation2 + $0x194] sm:$0xf0]  ;;  %v801_v35 = vld [vmem:[#allocation2 + $0x128] sm:$0xf]  ;;  %v794_v36 = vor.u32 %v975_v26, %v793_v18 }
  0x13   :  { %v989_v30 = vld [vmem:[#allocation2 + $0x1b4] sm:$0xf]  ;;  %v867_v31 = vld [vmem:[#allocation2 + $0x1d4] sm:$0xf0]  ;;  %v842_v34 = vor.u32 %v981_v28, %v839_v29  ;;  %v976_v38 = vld [vmem:[#allocation2 + $0x148] sm:$0xf0] }
  0x14   :  { %v757_v32 = vld [vmem:[#allocation2 + $0xd8] sm:$0xf]  ;;  %542 = vmatpush.bf16.msra.mxu2 %v874_v19  ;;  %528 = vmatpush.bf16.msra.mxu1 %v906_v27  ;;  %v870_v37 = vor.u32 %v989_v30, %v867_v31  ;;  %v972_v39 = vld [vmem:[#allocation2 + $0x12c] sm:$0xf]  ;;  %v803_v40 = vld [vmem:[#allocation2 + $0x14c] sm:$0xf0]  ;;  %v802_v45 = vor.u32 %v976_v38, %v801_v35 }
  0x15   :  { %555 = vmatpush.bf16.msra.mxu3 %v878_v20  ;;  %v966_v41 = vld [vmem:[#allocation2 + $0xf8] sm:$0xf0]  ;;  %v980_v42 = vld [vmem:[#allocation2 + $0x16c] sm:$0xf]  ;;  %v831_v43 = vld [vmem:[#allocation2 + $0x18c] sm:$0xf0]  ;;  %v806_v46 = vor.u32 %v972_v39, %v803_v40 }
  0x16   :  { %517 = vmatpush.bf16.msra.mxu0 %v830_v22  ;;  %v721_v44 = vld [vmem:[#allocation2 + $0x90] sm:$0xf]  ;;  %v765_v47 = vld [vmem:[#allocation2 + $0xe0] sm:$0xf]  ;;  %v758_v48 = vor.u32 %v966_v41, %v757_v32  ;;  %v834_v49 = vor.u32 %v980_v42, %v831_v43  ;;  %v967_v50 = vld [vmem:[#allocation2 + $0x100] sm:$0xf0] }
  0x17   :  { %v963_v51 = vld [vmem:[#allocation2 + $0xe4] sm:$0xf]  ;;  %v767_v52 = vld [vmem:[#allocation2 + $0x104] sm:$0xf0]  ;;  %v957_v53 = vld [vmem:[#allocation2 + $0xb0] sm:$0xf0]  ;;  %v766_v57 = vor.u32 %v967_v50, %v765_v47 }
  0x18   :  { %543 = vmatpush.bf16.msra.mxu2 %v838_v33  ;;  %529 = vmatpush.bf16.msra.mxu1 %v870_v37  ;;  %v971_v54 = vld [vmem:[#allocation2 + $0x124] sm:$0xf]  ;;  %v795_v55 = vld [vmem:[#allocation2 + $0x144] sm:$0xf0]  ;;  %v770_v58 = vor.u32 %v963_v51, %v767_v52  ;;  %v729_v59 = vld [vmem:[#allocation2 + $0x98] sm:$0xf]  ;;  %v722_v60 = vor.u32 %v957_v53, %v721_v44 }
  0x19   :  { %556 = vmatpush.bf16.msra.mxu3 %v842_v34  ;;  %v685_v56 = vld [vmem:[#allocation2 + $0x48] sm:$0xf]  ;;  %v798_v61 = vor.u32 %v971_v54, %v795_v55  ;;  %v958_v62 = vld [vmem:[#allocation2 + $0xb8] sm:$0xf0]  ;;  %v731_v0 = vld [vmem:[#allocation2 + $0xbc] sm:$0xf0] }
  0x1a   :  { %518 = vmatpush.bf16.msra.mxu0 %v794_v36  ;;  %v954_v63 = vld [vmem:[#allocation2 + $0x9c] sm:$0xf]  ;;  %v948_v1 = vld [vmem:[#allocation2 + $0x68] sm:$0xf0]  ;;  %v759_v3 = vld [vmem:[#allocation2 + $0xfc] sm:$0xf0]  ;;  %v730_v5 = vor.u32 %v958_v62, %v729_v59 }
  0x1b   :  { %v962_v2 = vld [vmem:[#allocation2 + $0xdc] sm:$0xf]  ;;  %v649_v4 = vld [vmem:[#allocation2] sm:$0xf]  ;;  %v734_v6 = vor.u32 %v954_v63, %v731_v0  ;;  %v693_v7 = vld [vmem:[#allocation2 + $0x50] sm:$0xf]  ;;  %v686_v8 = vor.u32 %v948_v1, %v685_v56 }
  0x1c   :  { %544 = vmatpush.bf16.msra.mxu2 %v802_v45  ;;  %530 = vmatpush.bf16.msra.mxu1 %v834_v49  ;;  %v762_v9 = vor.u32 %v962_v2, %v759_v3  ;;  %v949_v10 = vld [vmem:[#allocation2 + $0x70] sm:$0xf0]  ;;  %v695_v12 = vld [vmem:[#allocation2 + $0x74] sm:$0xf0]  ;;  %v939_v13 = vld [vmem:[#allocation2 + $0x20] sm:$0xf0] }
  0x1d   :  { %557 = vmatpush.bf16.msra.mxu3 %v806_v46  ;;  %v945_v11 = vld [vmem:[#allocation2 + $0x54] sm:$0xf]  ;;  %v723_v15 = vld [vmem:[#allocation2 + $0xb4] sm:$0xf0]  ;;  %v917_v16 = vld [vmem:[#allocation2 + $0x208] sm:$0xf]  ;;  %v694_v18 = vor.u32 %v949_v10, %v693_v7  ;;  %v650_v22 = vor.u32 %v939_v13, %v649_v4 }
  0x1e   :  { %519 = vmatpush.bf16.msra.mxu0 %v758_v48  ;;  %v953_v14 = vld [vmem:[#allocation2 + $0x94] sm:$0xf]  ;;  %v1004_v17 = vld [vmem:[#allocation2 + $0x228] sm:$0xf0]  ;;  %v698_v19 = vor.u32 %v945_v11, %v695_v12  ;;  %v657_v20 = vld [vmem:[#allocation2 + $0x8] sm:$0xf] }
  0x1f   :  { %v940_v21 = vld [vmem:[#allocation2 + $0x28] sm:$0xf0]  ;;  %v881_v23 = vld [vmem:[#allocation2 + $0x1c0] sm:$0xf]  ;;  %v726_v24 = vor.u32 %v953_v14, %v723_v15  ;;  %v659_v26 = vld [vmem:[#allocation2 + $0x2c] sm:$0xf0]  ;;  %v918_v28 = vor.u32 %v1004_v17, %v917_v16 }
  0x20   :  { %545 = vmatpush.bf16.msra.mxu2 %v766_v57  ;;  %531 = vmatpush.bf16.msra.mxu1 %v798_v61  ;;  %v936_v25 = vld [vmem:[#allocation2 + $0xc] sm:$0xf]  ;;  %v925_v27 = vld [vmem:[#allocation2 + $0x210] sm:$0xf]  ;;  %v1005_v29 = vld [vmem:[#allocation2 + $0x230] sm:$0xf0]  ;;  %v658_v35 = vor.u32 %v940_v21, %v657_v20 }
  0x21   :  { %558 = vmatpush.bf16.msra.mxu3 %v770_v58  ;;  %v1001_v30 = vld [vmem:[#allocation2 + $0x214] sm:$0xf]  ;;  %v927_v31 = vld [vmem:[#allocation2 + $0x234] sm:$0xf0]  ;;  %v995_v32 = vld [vmem:[#allocation2 + $0x1e0] sm:$0xf0]  ;;  %v662_v36 = vor.u32 %v936_v25, %v659_v26  ;;  %v926_v38 = vor.u32 %v1005_v29, %v925_v27 }
  0x22   :  { %520 = vmatpush.bf16.msra.mxu0 %v722_v60  ;;  %v944_v33 = vld [vmem:[#allocation2 + $0x4c] sm:$0xf]  ;;  %v687_v34 = vld [vmem:[#allocation2 + $0x6c] sm:$0xf0]  ;;  %v845_v37 = vld [vmem:[#allocation2 + $0x178] sm:$0xf]  ;;  %v930_v39 = vor.u32 %v1001_v30, %v927_v31  ;;  %v882_v41 = vor.u32 %v995_v32, %v881_v23 }
  0x23   :  { %v889_v40 = vld [vmem:[#allocation2 + $0x1c8] sm:$0xf]  ;;  %v690_v42 = vor.u32 %v944_v33, %v687_v34  ;;  %v996_v43 = vld [vmem:[#allocation2 + $0x1e8] sm:$0xf0]  ;;  %v891_v45 = vld [vmem:[#allocation2 + $0x1ec] sm:$0xf0] }
  0x24   :  { %546 = vmatpush.bf16.msra.mxu2 %v730_v5  ;;  %532 = vmatpush.bf16.msra.mxu1 %v762_v9  ;;  %v992_v44 = vld [vmem:[#allocation2 + $0x1cc] sm:$0xf]  ;;  %v986_v46 = vld [vmem:[#allocation2 + $0x198] sm:$0xf0]  ;;  %v935_v47 = vld [vmem:[#allocation2 + $0x4] sm:$0xf]  ;;  %v890_v52 = vor.u32 %v996_v43, %v889_v40 }
  0x25   :  { %559 = vmatpush.bf16.msra.mxu3 %v734_v6  ;;  %v651_v48 = vld [vmem:[#allocation2 + $0x24] sm:$0xf0]  ;;  %v1097_v49 = vld [vmem:[%s1135_s0] sm:$0xf]  ;;  %v1000_v50 = vld [vmem:[#allocation2 + $0x20c] sm:$0xf]  ;;  %v894_v53 = vor.u32 %v992_v44, %v891_v45  ;;  %v846_v55 = vor.u32 %v986_v46, %v845_v37 }
  0x26   :  { %521 = vmatpush.bf16.msra.mxu0 %v686_v8  ;;  %v919_v51 = vld [vmem:[#allocation2 + $0x22c] sm:$0xf0]  ;;  %v853_v54 = vld [vmem:[#allocation2 + $0x180] sm:$0xf]  ;;  %v654_v56 = vor.u32 %v935_v47, %v651_v48  ;;  %v987_v57 = vld [vmem:[#allocation2 + $0x1a0] sm:$0xf0] }
  0x27   :  { %v983_v58 = vld [vmem:[#allocation2 + $0x184] sm:$0xf]  ;;  %v855_v59 = vld [vmem:[#allocation2 + $0x1a4] sm:$0xf0]  ;;  %v809_v60 = vld [vmem:[#allocation2 + $0x130] sm:$0xf]  ;;  %v922_v62 = vor.u32 %v1000_v50, %v919_v51  ;;  %v854_v1 = vor.u32 %v987_v57, %v853_v54 }
  0x28   :  { %547 = vmatpush.bf16.msra.mxu2 %v694_v18  ;;  %533 = vmatpush.bf16.msra.mxu1 %v726_v24  ;;  %v977_v61 = vld [vmem:[#allocation2 + $0x150] sm:$0xf0]  ;;  %v991_v63 = vld [vmem:[#allocation2 + $0x1c4] sm:$0xf]  ;;  %v883_v0 = vld [vmem:[#allocation2 + $0x1e4] sm:$0xf0]  ;;  %v858_v2 = vor.u32 %v983_v58, %v855_v59 }
  0x29   :  { %560 = vmatpush.bf16.msra.mxu3 %v698_v19  ;;  %v817_v3 = vld [vmem:[#allocation2 + $0x138] sm:$0xf]  ;;  %v810_v4 = vor.u32 %v977_v61, %v809_v60  ;;  %v978_v5 = vld [vmem:[#allocation2 + $0x158] sm:$0xf0]  ;;  %v819_v7 = vld [vmem:[#allocation2 + $0x15c] sm:$0xf0]  ;;  %v886_v10 = vor.u32 %v991_v63, %v883_v0 }
  0x2a   :  { %522 = vmatpush.bf16.msra.mxu0 %v650_v22  ;;  %v974_v6 = vld [vmem:[#allocation2 + $0x13c] sm:$0xf]  ;;  %v773_v8 = vld [vmem:[#allocation2 + $0xe8] sm:$0xf]  ;;  %v968_v9 = vld [vmem:[#allocation2 + $0x108] sm:$0xf0]  ;;  %v818_v13 = vor.u32 %v978_v5, %v817_v3 }
  0x2b   :  { %v982_v11 = vld [vmem:[#allocation2 + $0x17c] sm:$0xf]  ;;  %v847_v12 = vld [vmem:[#allocation2 + $0x19c] sm:$0xf0]  ;;  %v822_v14 = vor.u32 %v974_v6, %v819_v7  ;;  %v781_v15 = vld [vmem:[#allocation2 + $0xf0] sm:$0xf]  ;;  %v774_v16 = vor.u32 %v968_v9, %v773_v8 }
  0x2c   :  { %548 = vmatpush.bf16.msra.mxu2 %v658_v35  ;;  %534 = vmatpush.bf16.msra.mxu1 %v690_v42  ;;  %v969_v17 = vld [vmem:[#allocation2 + $0x110] sm:$0xf0]  ;;  %v783_v19 = vld [vmem:[#allocation2 + $0x114] sm:$0xf0]  ;;  %v737_v20 = vld [vmem:[#allocation2 + $0xa0] sm:$0xf]  ;;  %v850_v22 = vor.u32 %v982_v11, %v847_v12 }
  0x2d   :  { %561 = vmatpush.bf16.msra.mxu3 %v662_v36  ;;  %523 = vmatmul.bf16.vlgmr.msra.gmra.mxu0 %v1097_v49  ;;  %v965_v18 = vld [vmem:[#allocation2 + $0xf4] sm:$0xf]  ;;  %v959_v21 = vld [vmem:[#allocation2 + $0xc0] sm:$0xf0]  ;;  %v811_v24 = vld [vmem:[#allocation2 + $0x154] sm:$0xf0]  ;;  %v782_v25 = vor.u32 %v969_v17, %v781_v15 }
  0x2e   :  { %567 = vmatpush.bf16.msrb.mxu0 %v918_v28  ;;  %v973_v23 = vld [vmem:[#allocation2 + $0x134] sm:$0xf]  ;;  %v786_v26 = vor.u32 %v965_v18, %v783_v19  ;;  %v745_v27 = vld [vmem:[#allocation2 + $0xa8] sm:$0xf]  ;;  %v738_v28 = vor.u32 %v959_v21, %v737_v20  ;;  %v960_v29 = vld [vmem:[#allocation2 + $0xc8] sm:$0xf0] }
  0x2f   :  { %549 = vmatmul.bf16.vlgmr.msra.gmra.mxu2 %v1097_v49  ;;  %v956_v30 = vld [vmem:[#allocation2 + $0xac] sm:$0xf]  ;;  %v747_v31 = vld [vmem:[#allocation2 + $0xcc] sm:$0xf0]  ;;  %v701_v32 = vld [vmem:[#allocation2 + $0x58] sm:$0xf]  ;;  %v814_v34 = vor.u32 %v973_v23, %v811_v24  ;;  %v746_v37 = vor.u32 %v960_v29, %v745_v27 }
  0x30   :  { %593 = vmatpush.bf16.msrb.mxu2 %v926_v38  ;;  %562 = vmatmul.bf16.vlgmr.msra.gmra.mxu3 %v1097_v49  ;;  %v950_v33 = vld [vmem:[#allocation2 + $0x78] sm:$0xf0]  ;;  %v964_v35 = vld [vmem:[#allocation2 + $0xec] sm:$0xf]  ;;  %v775_v36 = vld [vmem:[#allocation2 + $0x10c] sm:$0xf0]  ;;  %v750_v38 = vor.u32 %v956_v30, %v747_v31 }
  0x31   :  { %606 = vmatpush.bf16.msrb.mxu3 %v930_v39  ;;  %535 = vmatpush.bf16.msra.mxu1 %v654_v56  ;;  %v709_v39 = vld [vmem:[#allocation2 + $0x60] sm:$0xf]  ;;  %v702_v40 = vor.u32 %v950_v33, %v701_v32  ;;  %v947_v42 = vld [vmem:[#allocation2 + $0x64] sm:$0xf]  ;;  %v711_v43 = vld [vmem:[#allocation2 + $0x84] sm:$0xf0]  ;;  %v778_v47 = vor.u32 %v964_v35, %v775_v36 }
  0x32   :  { %568 = vmatpush.bf16.msrb.mxu0 %v882_v41  ;;  %v951_v41 = vld [vmem:[#allocation2 + $0x80] sm:$0xf0]  ;;  %v665_v44 = vld [vmem:[#allocation2 + $0x10] sm:$0xf]  ;;  %v941_v45 = vld [vmem:[#allocation2 + $0x30] sm:$0xf0] }
  0x33   :  { %v933_v46 = vld [vmem:[#allocation2 + $0x218] sm:$0xf]  ;;  %v1006_v48 = vld [vmem:[#allocation2 + $0x238] sm:$0xf0]  ;;  %v955_v50 = vld [vmem:[#allocation2 + $0xa4] sm:$0xf]  ;;  %v666_v54 = vor.u32 %v941_v45, %v665_v44 }
  0x34   :  { %594 = vmatpush.bf16.msrb.mxu2 %v890_v52  ;;  %536 = vmatmul.bf16.vlgmr.msra.gmra.mxu1 %v1097_v49  ;;  %v739_v51 = vld [vmem:[#allocation2 + $0xc4] sm:$0xf0]  ;;  %v710_v52 = vor.u32 %v951_v41, %v709_v39  ;;  %v942_v56 = vld [vmem:[#allocation2 + $0x38] sm:$0xf0]  ;;  %v934_v57 = vor.u32 %v1006_v48, %v933_v46  ;;  %v897_v58 = vld [vmem:[#allocation2 + $0x1d0] sm:$0xf] }
  0x35   :  { %607 = vmatpush.bf16.msrb.mxu3 %v894_v53  ;;  %580 = vmatpush.bf16.msrb.mxu1 %v922_v62  ;;  %v714_v53 = vor.u32 %v947_v42, %v711_v43  ;;  %v742_v59 = vor.u32 %v955_v50, %v739_v51  ;;  %v938_v60 = vld [vmem:[#allocation2 + $0x1c] sm:$0xf]  ;;  %v675_v61 = vld [vmem:[#allocation2 + $0x3c] sm:$0xf0]  ;;  %v997_v62 = vld [vmem:[#allocation2 + $0x1f0] sm:$0xf0] }
  0x36   :  { %569 = vmatpush.bf16.msrb.mxu0 %v846_v55  ;;  %v673_v55 = vld [vmem:[#allocation2 + $0x18] sm:$0xf]  ;;  %v946_v63 = vld [vmem:[#allocation2 + $0x5c] sm:$0xf]  ;;  %v703_v0 = vld [vmem:[#allocation2 + $0x7c] sm:$0xf0]  ;;  %v898_v3 = vor.u32 %v997_v62, %v897_v58 }
  0x37   :  { %v706_v5 = vor.u32 %v946_v63, %v703_v0  ;;  %v988_v6 = vld [vmem:[#allocation2 + $0x1a8] sm:$0xf0]  ;;  %v937_v7 = vld [vmem:[#allocation2 + $0x14] sm:$0xf]  ;;  %v667_v8 = vld [vmem:[#allocation2 + $0x34] sm:$0xf0] }
  0x38   :  { %595 = vmatpush.bf16.msrb.mxu2 %v854_v1  ;;  %v674_v1 = vor.u32 %v942_v56, %v673_v55  ;;  %v825_v11 = vld [vmem:[#allocation2 + $0x140] sm:$0xf]  ;;  %v979_v12 = vld [vmem:[#allocation2 + $0x160] sm:$0xf0]  ;;  %v970_v15 = vld [vmem:[#allocation2 + $0x118] sm:$0xf0] }
  0x39   :  { %608 = vmatpush.bf16.msrb.mxu3 %v858_v2  ;;  %581 = vmatpush.bf16.msrb.mxu1 %v886_v10  ;;  %v678_v2 = vor.u32 %v938_v60, %v675_v61  ;;  %v670_v10 = vor.u32 %v937_v7, %v667_v8  ;;  %v753_v17 = vld [vmem:[#allocation2 + $0xb0] sm:$0xf]  ;;  %v961_v18 = vld [vmem:[#allocation2 + $0xd0] sm:$0xf0]  ;;  %v717_v20 = vld [vmem:[#allocation2 + $0x68] sm:$0xf] }
  0x3a   :  { %570 = vmatpush.bf16.msrb.mxu0 %v810_v4  ;;  %v861_v4 = vld [vmem:[#allocation2 + $0x188] sm:$0xf]  ;;  %v754_v19 = vor.u32 %v961_v18, %v753_v17  ;;  %v952_v21 = vld [vmem:[#allocation2 + $0x88] sm:$0xf0]  ;;  %v681_v23 = vld [vmem:[#allocation2 + $0x20] sm:$0xf] }
  0x3b   :  { %v862_v9 = vor.u32 %v988_v6, %v861_v4  ;;  %v943_v24 = vld [vmem:[#allocation2 + $0x40] sm:$0xf0] }
  0x3c   :  { %596 = vmatpush.bf16.msrb.mxu2 %v818_v13  ;;  %v826_v13 = vor.u32 %v979_v12, %v825_v11 }
  0x3d   :  { %609 = vmatpush.bf16.msrb.mxu3 %v822_v14  ;;  %582 = vmatpush.bf16.msrb.mxu1 %v850_v22  ;;  %v789_v14 = vld [vmem:[#allocation2 + $0xf8] sm:$0xf]  ;;  %v718_v22 = vor.u32 %v952_v21, %v717_v20 }
  0x3e   :  { %571 = vmatpush.bf16.msrb.mxu0 %v774_v16  ;;  %v790_v16 = vor.u32 %v970_v15, %v789_v14 }
  0x40   :  { %597 = vmatpush.bf16.msrb.mxu2 %v782_v25  ;;  %v682_v25 = vor.u32 %v943_v24, %v681_v23 }
  0x41   :  { %610 = vmatpush.bf16.msrb.mxu3 %v786_v26  ;;  %583 = vmatpush.bf16.msrb.mxu1 %v814_v34  ;;  %v125_v26 = vld [vmem:[#allocation4] sm:$0xff] }
  0x42   :  { %572 = vmatpush.bf16.msrb.mxu0 %v738_v28  ;;  %v129_v27 = vperm.slane %v125_v26, 0  ;;  %v131_v30 = vperm.slane %v125_v26, 2  ;;  %v130_v31 = vperm.slane %v125_v26, 1  ;;  %v132_v32 = vperm.slane %v125_v26, 3 }
  0x43   :  { %v133_v42 = vperm.slane %v125_v26, 4  ;;  %v134_v45 = vperm.slane %v125_v26, 5  ;;  %v135_v46 = vperm.slane %v125_v26, 6 }
  0x44   :  { %598 = vmatpush.bf16.msrb.mxu2 %v746_v37 }
  0x45   :  { %611 = vmatpush.bf16.msrb.mxu3 %v750_v38  ;;  %584 = vmatpush.bf16.msrb.mxu1 %v778_v47  ;;  %v136_v47 = vperm.slane %v125_v26, 7 }
  0x46   :  { %573 = vmatpush.bf16.msrb.mxu0 %v702_v40 }
  0x48   :  { %599 = vmatpush.bf16.msrb.mxu2 %v710_v52 }
  0x49   :  { %612 = vmatpush.bf16.msrb.mxu3 %v714_v53  ;;  %585 = vmatpush.bf16.msrb.mxu1 %v742_v59  ;;  %v1011_v59 = vld [vmem:[#allocation4 + $0x8] ss:$0 sm:$0xff] }
  0x4a   :  { %574 = vmatpush.bf16.msrb.mxu0 %v666_v54 }
  0x4c   :  { %600 = vmatpush.bf16.msrb.mxu2 %v674_v1 }
  0x4d   :  { %575 = vmatmul.bf16.vlgmr.msrb.gmra.mxu0 %v1097_v49  ;;  %613 = vmatpush.bf16.msrb.mxu3 %v678_v2 }
  0x4e   :  { %619 = vmatpush.bf16.msra.mxu0 %v934_v57  ;;  %586 = vmatpush.bf16.msrb.mxu1 %v706_v5 }
  0x4f   :  { %601 = vmatmul.bf16.vlgmr.msrb.gmra.mxu2 %v1097_v49 }
  0x50   :  { %614 = vmatmul.bf16.vlgmr.msrb.gmra.mxu3 %v1097_v49 }
  0x52   :  { %620 = vmatpush.bf16.msra.mxu0 %v898_v3  ;;  %587 = vmatpush.bf16.msrb.mxu1 %v670_v10 }
  0x55   :  { %588 = vmatmul.bf16.vlgmr.msrb.gmra.mxu1 %v1097_v49 }
  0x56   :  { %621 = vmatpush.bf16.msra.mxu0 %v862_v9 }
  0x5a   :  { %622 = vmatpush.bf16.msra.mxu0 %v826_v13 }
  0x5e   :  { %623 = vmatpush.bf16.msra.mxu0 %v790_v16 }
  0x62   :  { %624 = vmatpush.bf16.msra.mxu0 %v754_v19 }
  0x66   :  { %625 = vmatpush.bf16.msra.mxu0 %v718_v22 }
  0x6a   :  { %626 = vmatpush.bf16.msra.mxu0 %v682_v25 }
  0x6d   :  { %627 = vmatmul.bf16.vlgmr.msra.gmra.mxu0 %v1097_v49 }
  0xaa   :  { %v524_v28 = vpop.f32.mrf.mxu0 }
  0xab   :  { %v525_v29 = vadd.f32 %v524_v28, %v129_v27 }
  0xad   :  { %632 = vst [vmem:[%s1138_s3] sm:$0xff] %v525_v29 }
  0xb1   :  { %v537_v34 = vpop.f32.mrf.mxu1 }
  0xb2   :  { %v550_v33 = vpop.f32.mrf.mxu2  ;;  %v526_v37 = vpop.f32.mrf.mxu0  ;;  %v538_v38 = vadd.f32 %v537_v34, %v130_v31 }
  0xb3   :  { %v551_v35 = vadd.f32 %v550_v33, %v131_v30  ;;  %v563_v36 = vpop.f32.mrf.mxu3 }
  0xb4   :  { %v564_v39 = vadd.f32 %v563_v36, %v132_v32  ;;  %633 = vst [vmem:[%s1138_s3 + $0x8] sm:$0xff] %v538_v38 }
  0xb5   :  { %634 = vst [vmem:[%s1138_s3 + $0x10] sm:$0xff] %v551_v35 }
  0xb6   :  { %635 = vst [vmem:[%s1138_s3 + $0x18] sm:$0xff] %v564_v39 }
  0xb9   :  { %v539_v40 = vpop.f32.mrf.mxu1 }
  0xba   :  { %v552_v49 = vpop.f32.mrf.mxu2 }
  0xbb   :  { %v565_v41 = vpop.f32.mrf.mxu3 }
  0xca   :  { %v576_v43 = vpop.f32.mrf.mxu0 }
  0xcb   :  { %v577_v44 = vadd.f32 %v576_v43, %v133_v42 }
  0xcd   :  { %636 = vst [vmem:[%s1138_s3 + $0x20] sm:$0xff] %v577_v44 }
  0xd2   :  { %v578_v48 = vpop.f32.mrf.mxu0  ;;  %v589_v50 = vpop.f32.mrf.mxu1 }
  0xd3   :  { %v602_v51 = vpop.f32.mrf.mxu2  ;;  %v590_v52 = vadd.f32 %v589_v50, %v134_v45  ;;  %v615_v54 = vpop.f32.mrf.mxu3 }
  0xd4   :  { %v603_v53 = vadd.f32 %v602_v51, %v135_v46  ;;  %v616_v55 = vadd.f32 %v615_v54, %v136_v47 }
  0xd5   :  { %637 = vst [vmem:[%s1138_s3 + $0x28] sm:$0xff] %v590_v52 }
  0xd6   :  { %638 = vst [vmem:[%s1138_s3 + $0x30] sm:$0xff] %v603_v53 }
  0xd7   :  { %639 = vst [vmem:[%s1138_s3 + $0x38] sm:$0xff] %v616_v55 }
  0xda   :  { %v591_v56 = vpop.f32.mrf.mxu1 }
  0xdb   :  { %v604_v57 = vpop.f32.mrf.mxu2  ;;  %v617_v58 = vpop.f32.mrf.mxu3 }
  0xea   :  { %v628_v60 = vpop.f32.mrf.mxu0 }
  0xeb   :  { %v629_v61 = vadd.f32 %v1011_v59, %v628_v60 }
  0xed   :  { %640 = vst [vmem:[%s1138_s3 + $0x40] sm:$0xff] %v629_v61 }
  0xf2   :  { %v630_v62 = vpop.f32.mrf.mxu0 }
  0xf3   :  { %645 = vsyncpa [#allocation3], 1 }
  0xf4   :  { %646 = vsyncpa [#allocation5], 1 }

</bundles_post_ra>
